<compile_context>
chip_gen: v6e
topology: v6e:2x2x1
jax: 0.10.0
libtpu: 0.0.40
codegen_flags: <defaults>
</compile_context>

<pallas_src>
import functools

import jax
import jax.numpy as jnp
from jax import lax
from jax.experimental import pallas as pl
from jax.experimental.pallas import tpu as pltpu


def _round_up(a, b):
    return (a + b - 1) // b * b


def _conv_relu_kernel(x_ref, w_ref, o_ref, patch_ref, *,
                      KH, KW, Wp, stride, L_pad, C8):
    """One grid step = one batch element.

    x_ref:     (1, C8, FLAT)        zero-padded image (channels padded to C8),
                                    spatial flattened (Hp*Wp + tail of zeros)
    w_ref:     (C_out, KH*KW*C8)    packed weight, K ordered as (kh, kw, cin)
    o_ref:     (1, C_out, L_pad)    lane-dense output (virtual columns = Ho*Wp, padded)
    patch_ref: (KH*KW*C8, L_pad)    VMEM im2col scratch
    """
    # Build the im2col matrix.  Every tap is a contiguous (stride=1) lane slice of
    # the flattened padded image, and every write covers a full 8-sublane-aligned
    # (C8, L_pad) block -> unmasked VMEM stores, no tile-crossing reshapes.
    for kh in range(KH):
        for kw in range(KW):
            t = kh * KW + kw
            off = kh * Wp + kw                       # static python int
            if stride == 1:
                tap = x_ref[0, :, pl.ds(off, L_pad)]
            else:
                # stride handled as a lane-strided read of the flat layout
                tap = x_ref[0, :, pl.ds(off, L_pad, stride)]
            patch_ref[pl.ds(t * C8, C8), :] = tap

    # One MXU contraction with K = KH*KW*C8; result is (C_out, spatial), i.e.
    # already NCHW-ordered and lane-dense.  Fused ReLU on the way out.
    acc = jnp.dot(w_ref[...], patch_ref[...],
                  preferred_element_type=jnp.float32)
    o_ref[0] = jnp.maximum(acc, 0.0).astype(o_ref.dtype)


def conv_relu(x_nchw, weight_oihw, stride, padding):
    """relu(conv2d(x, w, stride, padding, bias=False)) — matches F.relu(nn.Conv2d(...)(x))."""
    N, C_in, H, W = x_nchw.shape
    C_out, C_in_w, KH, KW = weight_oihw.shape
    assert C_in == C_in_w

    Hp, Wp = H + 2 * padding, W + 2 * padding
    assert Hp >= KH and Wp >= KW, "degenerate conv: kernel larger than padded input"
    Ho = (Hp - KH) // stride + 1
    Wo = (Wp - KW) // stride + 1

    # Channels padded to a multiple of 8 so every im2col write is sublane-aligned.
    C8 = _round_up(C_in, 8)

    # Virtual output columns: one row of Wp columns per output row (the extra
    # Wp - Wo columns per row are over-computed garbage, cropped afterwards).
    L_valid = Ho * Wp
    L_pad = _round_up(L_valid, 128)          # lane-dense output tile

    # Flat padded-input length: every (tap offset, virtual column) read must be
    # in bounds of the zero-filled flat buffer.
    max_read = (KH - 1) * Wp + (KW - 1) + stride * (L_pad - 1)
    FLAT = _round_up(max(Hp * Wp, max_read + 1), 128)

    # ---- glue (plain JAX): pad channels + spatial, flatten spatial, pack weight ----
    xp = jnp.pad(x_nchw, ((0, 0), (0, C8 - C_in),
                          (padding, padding), (padding, padding)))
    x_flat = xp.reshape(N, C8, Hp * Wp)
    x_flat = jnp.pad(x_flat, ((0, 0), (0, 0), (0, FLAT - Hp * Wp)))

    # OIHW -> (C_out, KH, KW, C_in) -> zero-pad cin to C8 -> (C_out, KH*KW*C8).
    KK = KH * KW * C8
    w = jnp.transpose(weight_oihw, (0, 2, 3, 1))          # (C_out, KH, KW, C_in)
    w = jnp.pad(w, ((0, 0), (0, 0), (0, 0), (0, C8 - C_in)))
    w = w.reshape(C_out, KK)

    kernel = functools.partial(
        _conv_relu_kernel,
        KH=KH, KW=KW, Wp=Wp, stride=stride, L_pad=L_pad, C8=C8)

    out_flat = pl.pallas_call(
        kernel,
        out_shape=jax.ShapeDtypeStruct((N, C_out, L_pad), x_nchw.dtype),
        grid_spec=pltpu.PrefetchScalarGridSpec(
            num_scalar_prefetch=0,
            grid=(N,),  # one grid step per batch element
            in_specs=[
                pl.BlockSpec((1, C8, FLAT), lambda n: (n, 0, 0)),
                pl.BlockSpec((C_out, KK), lambda n: (0, 0)),   # resident across steps
            ],
            out_specs=pl.BlockSpec((1, C_out, L_pad), lambda n: (n, 0, 0)),
            scratch_shapes=[pltpu.VMEM((KK, L_pad), x_nchw.dtype)],
        ),
        compiler_params=pltpu.CompilerParams(
            dimension_semantics=("parallel",),        # batch across cores (v7x megacore)
            vmem_limit_bytes=32 * 1024 * 1024,        # explicit; fits v5e/v6e/v7x budgets
        ),
    )(x_flat, w)

    # Already NCHW-ordered: drop over-computed wrap columns, reshape (row-major, free).
    out = out_flat[:, :, :L_valid].reshape(N, C_out, Ho, Wp)[:, :, :, :Wo]
    return out


if __name__ == "__main__":
    # Module config: Conv(C_in=4, C_out=8, kernel_size=3, stride=1, padding=1)
    N, C_in, C_out, H, W = 2, 4, 8, 16, 16
    kernel_size, stride, padding = 3, 1, 1

    key = jax.random.PRNGKey(0)
    kx, kw = jax.random.split(key)
    x = jax.random.normal(kx, (N, C_in, H, W), dtype=jnp.float32)
    # Deterministic synthetic weight, PyTorch Conv2d layout (C_out, C_in, KH, KW), bias=False.
    weight = 0.1 * jax.random.normal(
        kw, (C_out, C_in, kernel_size, kernel_size), dtype=jnp.float32)

    out = conv_relu(x, weight, stride, padding)
    out = jax.block_until_ready(out)

    # Reference check with plain JAX conv (same semantics as F.relu(F.conv2d(...))).
    ref = jax.nn.relu(lax.conv_general_dilated(
        x, weight, window_strides=(stride, stride),
        padding=((padding, padding), (padding, padding)),
        dimension_numbers=("NCHW", "OIHW", "NCHW")))
    assert out.shape == (N, C_out, H, W)
    assert jnp.allclose(out, ref, atol=1e-4, rtol=1e-4), "mismatch vs reference conv"

    print("KERNEL_OK")
</pallas_src>

<mosaic_0001>
module attributes {stable_mosaic.version = 11 : i64} {
  func.func @_conv_relu_kernel(%arg0: i32, %arg1: memref<1x8x512xf32, #tpu.memory_space<vmem>>, %arg2: memref<8x72xf32, #tpu.memory_space<vmem>>, %arg3: memref<1x8x384xf32, #tpu.memory_space<vmem>>, %arg4: memref<72x384xf32, #tpu.memory_space<vmem>>) attributes {dimension_semantics = [#tpu.dimension_semantics<parallel>], iteration_bounds = array<i64: 2>, scalar_prefetch = 0 : i64, scratch_operands = 1 : i64, tpu.core_type = #tpu.core_type<tc>, window_params = [{transform_indices = @transform_0, window_bounds = array<i64: 1, 8, 512>}, {pipeline_mode = #tpu.pipeline_mode<synchronous>, transform_indices = @transform_1, window_bounds = array<i64: 8, 72>}, {transform_indices = @transform_2, window_bounds = array<i64: 1, 8, 384>}]} {
    %c0 = arith.constant 0 : index
    %c0_0 = arith.constant 0 : index
    %c0_1 = arith.constant 0 : index
    %0 = vector.load %arg1[%c0, %c0_0, %c0_1] : memref<1x8x512xf32, #tpu.memory_space<vmem>>, vector<1x8x384xf32>
    %1 = vector.shape_cast %0 : vector<1x8x384xf32> to vector<8x384xf32>
    %c0_2 = arith.constant 0 : index
    %c0_3 = arith.constant 0 : index
    %2 = vector.load %arg4[%c0_2, %c0_3] : memref<72x384xf32, #tpu.memory_space<vmem>>, vector<8x384xf32>
    tpu.vector_store %arg4[%c0_2, %c0_3], %1 {strides = array<i32>} : memref<72x384xf32, #tpu.memory_space<vmem>>, vector<8x384xf32>,
    %c0_4 = arith.constant 0 : index
    %c0_5 = arith.constant 0 : index
    %c1 = arith.constant 1 : index
    %3 = vector.load %arg1[%c0_4, %c0_5, %c1] : memref<1x8x512xf32, #tpu.memory_space<vmem>>, vector<1x8x384xf32>
    %4 = vector.shape_cast %3 : vector<1x8x384xf32> to vector<8x384xf32>
    %c8 = arith.constant 8 : index
    %c0_6 = arith.constant 0 : index
    %5 = vector.load %arg4[%c8, %c0_6] : memref<72x384xf32, #tpu.memory_space<vmem>>, vector<8x384xf32>
    tpu.vector_store %arg4[%c8, %c0_6], %4 {strides = array<i32>} : memref<72x384xf32, #tpu.memory_space<vmem>>, vector<8x384xf32>,
    %c0_7 = arith.constant 0 : index
    %c0_8 = arith.constant 0 : index
    %c2 = arith.constant 2 : index
    %6 = vector.load %arg1[%c0_7, %c0_8, %c2] : memref<1x8x512xf32, #tpu.memory_space<vmem>>, vector<1x8x384xf32>
    %7 = vector.shape_cast %6 : vector<1x8x384xf32> to vector<8x384xf32>
    %c16 = arith.constant 16 : index
    %c0_9 = arith.constant 0 : index
    %8 = vector.load %arg4[%c16, %c0_9] : memref<72x384xf32, #tpu.memory_space<vmem>>, vector<8x384xf32>
    tpu.vector_store %arg4[%c16, %c0_9], %7 {strides = array<i32>} : memref<72x384xf32, #tpu.memory_space<vmem>>, vector<8x384xf32>,
    %c0_10 = arith.constant 0 : index
    %c0_11 = arith.constant 0 : index
    %c18 = arith.constant 18 : index
    %9 = vector.load %arg1[%c0_10, %c0_11, %c18] : memref<1x8x512xf32, #tpu.memory_space<vmem>>, vector<1x8x384xf32>
    %10 = vector.shape_cast %9 : vector<1x8x384xf32> to vector<8x384xf32>
    %c24 = arith.constant 24 : index
    %c0_12 = arith.constant 0 : index
    %11 = vector.load %arg4[%c24, %c0_12] : memref<72x384xf32, #tpu.memory_space<vmem>>, vector<8x384xf32>
    tpu.vector_store %arg4[%c24, %c0_12], %10 {strides = array<i32>} : memref<72x384xf32, #tpu.memory_space<vmem>>, vector<8x384xf32>,
    %c0_13 = arith.constant 0 : index
    %c0_14 = arith.constant 0 : index
    %c19 = arith.constant 19 : index
    %12 = vector.load %arg1[%c0_13, %c0_14, %c19] : memref<1x8x512xf32, #tpu.memory_space<vmem>>, vector<1x8x384xf32>
    %13 = vector.shape_cast %12 : vector<1x8x384xf32> to vector<8x384xf32>
    %c32 = arith.constant 32 : index
    %c0_15 = arith.constant 0 : index
    %14 = vector.load %arg4[%c32, %c0_15] : memref<72x384xf32, #tpu.memory_space<vmem>>, vector<8x384xf32>
    tpu.vector_store %arg4[%c32, %c0_15], %13 {strides = array<i32>} : memref<72x384xf32, #tpu.memory_space<vmem>>, vector<8x384xf32>,
    %c0_16 = arith.constant 0 : index
    %c0_17 = arith.constant 0 : index
    %c20 = arith.constant 20 : index
    %15 = vector.load %arg1[%c0_16, %c0_17, %c20] : memref<1x8x512xf32, #tpu.memory_space<vmem>>, vector<1x8x384xf32>
    %16 = vector.shape_cast %15 : vector<1x8x384xf32> to vector<8x384xf32>
    %c40 = arith.constant 40 : index
    %c0_18 = arith.constant 0 : index
    %17 = vector.load %arg4[%c40, %c0_18] : memref<72x384xf32, #tpu.memory_space<vmem>>, vector<8x384xf32>
    tpu.vector_store %arg4[%c40, %c0_18], %16 {strides = array<i32>} : memref<72x384xf32, #tpu.memory_space<vmem>>, vector<8x384xf32>,
    %c0_19 = arith.constant 0 : index
    %c0_20 = arith.constant 0 : index
    %c36 = arith.constant 36 : index
    %18 = vector.load %arg1[%c0_19, %c0_20, %c36] : memref<1x8x512xf32, #tpu.memory_space<vmem>>, vector<1x8x384xf32>
    %19 = vector.shape_cast %18 : vector<1x8x384xf32> to vector<8x384xf32>
    %c48 = arith.constant 48 : index
    %c0_21 = arith.constant 0 : index
    %20 = vector.load %arg4[%c48, %c0_21] : memref<72x384xf32, #tpu.memory_space<vmem>>, vector<8x384xf32>
    tpu.vector_store %arg4[%c48, %c0_21], %19 {strides = array<i32>} : memref<72x384xf32, #tpu.memory_space<vmem>>, vector<8x384xf32>,
    %c0_22 = arith.constant 0 : index
    %c0_23 = arith.constant 0 : index
    %c37 = arith.constant 37 : index
    %21 = vector.load %arg1[%c0_22, %c0_23, %c37] : memref<1x8x512xf32, #tpu.memory_space<vmem>>, vector<1x8x384xf32>
    %22 = vector.shape_cast %21 : vector<1x8x384xf32> to vector<8x384xf32>
    %c56 = arith.constant 56 : index
    %c0_24 = arith.constant 0 : index
    %23 = vector.load %arg4[%c56, %c0_24] : memref<72x384xf32, #tpu.memory_space<vmem>>, vector<8x384xf32>
    tpu.vector_store %arg4[%c56, %c0_24], %22 {strides = array<i32>} : memref<72x384xf32, #tpu.memory_space<vmem>>, vector<8x384xf32>,
    %c0_25 = arith.constant 0 : index
    %c0_26 = arith.constant 0 : index
    %c38 = arith.constant 38 : index
    %24 = vector.load %arg1[%c0_25, %c0_26, %c38] : memref<1x8x512xf32, #tpu.memory_space<vmem>>, vector<1x8x384xf32>
    %25 = vector.shape_cast %24 : vector<1x8x384xf32> to vector<8x384xf32>
    %c64 = arith.constant 64 : index
    %c0_27 = arith.constant 0 : index
    %26 = vector.load %arg4[%c64, %c0_27] : memref<72x384xf32, #tpu.memory_space<vmem>>, vector<8x384xf32>
    tpu.vector_store %arg4[%c64, %c0_27], %25 {strides = array<i32>} : memref<72x384xf32, #tpu.memory_space<vmem>>, vector<8x384xf32>,
    %c0_28 = arith.constant 0 : index
    %c0_29 = arith.constant 0 : index
    %27 = vector.load %arg2[%c0_28, %c0_29] : memref<8x72xf32, #tpu.memory_space<vmem>>, vector<8x72xf32>
    %c0_30 = arith.constant 0 : index
    %c0_31 = arith.constant 0 : index
    %28 = vector.load %arg4[%c0_30, %c0_31] : memref<72x384xf32, #tpu.memory_space<vmem>>, vector<72x384xf32>
    %cst = arith.constant dense<0.000000e+00> : vector<8x384xf32>
    %29 = tpu.matmul %27, %28, %cst {dimension_numbers = #tpu.dot_dimension_numbers<[1], [0], [0], [1], [0, 0, 1, 1], [], []>} : vector<8x72xf32>, vector<72x384xf32>, vector<8x384xf32> -> vector<8x384xf32>
    %cst_32 = arith.constant 0.000000e+00 : f32
    %30 = vector.broadcast %cst_32 : f32 to vector<8x384xf32>
    %31 = arith.maximumf %29, %30 : vector<8x384xf32>
    %c0_33 = arith.constant 0 : index
    %c0_34 = arith.constant 0 : index
    %c0_35 = arith.constant 0 : index
    %32 = vector.load %arg3[%c0_33, %c0_34, %c0_35] : memref<1x8x384xf32, #tpu.memory_space<vmem>>, vector<1x8x384xf32>
    %33 = vector.shape_cast %32 : vector<1x8x384xf32> to vector<8x384xf32>
    %34 = vector.shape_cast %31 : vector<8x384xf32> to vector<1x8x384xf32>
    tpu.vector_store %arg3[%c0_33, %c0_34, %c0_35], %34 {strides = array<i32>} : memref<1x8x384xf32, #tpu.memory_space<vmem>>, vector<1x8x384xf32>,
    return
  }
  func.func @transform_0(%arg0: i32) -> (i32, i32, i32) {
    %c0_i32 = arith.constant 0 : i32
    %c0_i32_0 = arith.constant 0 : i32
    %c0_i32_1 = arith.constant 0 : i32
    return %arg0, %c0_i32, %c0_i32_0 : i32, i32, i32
  }
  func.func @transform_1(%arg0: i32) -> (i32, i32) {
    %c0_i32 = arith.constant 0 : i32
    %c0_i32_0 = arith.constant 0 : i32
    %c0_i32_1 = arith.constant 0 : i32
    return %c0_i32, %c0_i32_0 : i32, i32
  }
  func.func @transform_2(%arg0: i32) -> (i32, i32, i32) {
    %c0_i32 = arith.constant 0 : i32
    %c0_i32_0 = arith.constant 0 : i32
    %c0_i32_1 = arith.constant 0 : i32
    return %arg0, %c0_i32, %c0_i32_0 : i32, i32, i32
  }
}

</mosaic_0001>

<bundles_post_ra>
// kernel: tpu_custom_call.1
= control target key start
LH: loop header
LB: loop body
LE: loop exit
PB: predicated region body
PF: predicated region fallthrough
CT: control target
= control target key end

     0   :  { %7 = vsyncpa [#allocation4], 0  ;;  %s1170_s0 = inlined_call_operand.hbm [shape: f32[2,8,512], index: 0, kind: input, shape index: {}]   ;;  %s1171_s1 = inlined_call_operand.hbm [shape: f32[8,72], index: 1, kind: input, shape index: {}]   ;;  %s1172_s2 = inlined_call_operand.hbm [shape: f32[2,8,384], index: 2, kind: output, shape index: {}]  }
   0x1   :  { %9 = vsyncpa [#allocation4 + $0x1], 0 }
   0x2   :  { %10 = vsyncpa [#allocation7], 0 }
   0x3   :  { %11 = vsyncpa [#allocation5], 0 }
   0x4   :  { %13 = vsyncpa [#allocation5 + $0x1], 0  ;;  %s929_s9 = smov 0   ;;  %s931_s10 = smov 0  }
   0x5   :  { %s933_s11 = smov 0   ;;  %s935_s12 = smov 0  }
   0x6 LB: > { %s950_s13 = sadd.s32 4294967295, %s899_s12   ;;  %s661_s14 = sadd.s32 4294967294, %s899_s12   ;;  %s899_s12 = sphi %s935_s12, %s1195_s12   ;;  %s895_s11 = sphi %s933_s11, %s1194_s11   ;;  %s891_s10 = sphi %s931_s10, %s1193_s10   ;;  %s887_s9 = sphi %s929_s9, %s1192_s9  }
   0x7   : > { %p39_p0 = scmp.ne.s32.totalorder %s891_s10, %s887_s9  ;;  %p1173_p1 = scmp.eq.s32.totalorder %s950_s13, 0 }
   0x8   : > { %p90_p3 = scmp.eq.s32.totalorder %s661_s14, 1  ;;  %p662_p5 = scmp.ge.s32.totalorder %s899_s12, 1 }
   0x9   : > { %p959_p4 = por %p1173_p1, %p39_p0  ;;  %p97_p7 = scmp.lt.s32.totalorder %s899_s12, 3 }
   0xa   : > { %p964_p6 = por %p90_p3, %p39_p0  ;;  %s901_s18 = smov [#allocation6]  }
   0xb   : > { %s1177_s15 = scalar_select %p959_p4, 1, 0 }
   0xc   : > { %s1178_s16 = scalar_select %p964_p6, 1, 0 }
   0xd   : > { %p969_p8 = pnand %p662_p5, %p97_p7  ;;  %s110_s19 = sshll.u32 %s901_s18, 4  ;;  %s111_s19 = int_to_ptr.vmem [resolvable:$true] %s110_s19 }
   0xe   : > { %s977_s20 = sadd.s32 1, %s899_s12   ;;  %s26_s24 = sadd.s32 1, %s895_s11 }
   0xf   : > { %s1179_s17 = scalar_select %p969_p8, 1, 0 }
  0x10   : > { %p718_p10 = pneg %p969_p8  ;;  %s23_s22 = ssub.s32 %s899_s12, %s977_s20 }
  0x11   : > { %p987_p12 = scmp.eq.s32.totalorder %s23_s22, 0  ;;  %p33_p13 = scmp.ne.s32.totalorder %s895_s11, %s891_s10 }
  0x12   : > { %p981_p11 = pnand %p718_p10, %p1173_p1  ;;  %s788_s25 = scalar_lea.vmem %s111_s19, 128 }
  0x13   : > { %p789_p3 = scmp.ne.s32.totalorder %s111_s19, %s788_s25  ;;  %p796_p9 = scmp.lt.s32.totalorder %s111_s19, %s111_s19 }
  0x14   : > { %p779_p0 = pneg %p981_p11  ;;  %p797_p2 = scmp.lt.s32.totalorder %s788_s25, %s788_s25 }
  0x16   : > { %p791_p5 = pnand %p789_p3, %p779_p0  ;;  %p798_p10 = por %p797_p2, %p796_p9 }
  0x18   : > { %p792_p7 = pneg %p791_p5 }
  0x1a   : > { %p799_p1 = pnand %p798_p10, %p792_p7 }
  0x1c   : > { %802 = shalt.err (!%p799_p1)
}
  0x1d   : > { %721 = dma.hbm_to_vmem [thread:$0]  (!%p981_p11), %s1171_s1, 128, %s111_s19, [#allocation7]  }
  0x1e   : > { %s1004_s28 = scalar_select %p987_p12, %s895_s11, %s26_s24  }
  0x1f   : > { %p34_p1 = scmp.eq.s32.totalorder %s899_s12, 0  ;;  %p1182_p2 = scmp.eq.s32.totalorder %s950_s13, 1 }
  0x20   : > { %p731_p0 = scmp.lt.s32.totalorder %s899_s12, 2  ;;  %s121_s30 = sand.u32 1, %s895_s11  }
  0x21   : > { %p1012_p9 = por %p1182_p2, %p33_p13  ;;  %p35_p3 = por %p34_p1, %p33_p13 }
  0x22   : > { %s665_s3 = sshll.u32 %s121_s30, 5  ;;  %s676_s4 = sshll.u32 %s899_s12, 9 }
  0x23   : > { %s1183_s29 = scalar_select %p1012_p9, 1, 0 }
  0x24   : > { %s1025_s7 = scalar_lea.hbm %s1170_s0, %s676_s4  ;;  %s125_s8 = scalar_lea.vmem [#allocation3], %s665_s3 }
  0x25   : > { %s133_s14 = sshll.u32 %s125_s8, 4  ;;  %p1027_p11 = pnand %p731_p0, %p35_p3  ;;  %s134_s14 = int_to_ptr.vmem [resolvable:$true] %s133_s14 }
  0x26   : > { %s122_s19 = scalar_lea.sflag [#allocation4], %s121_s30  ;;  %s803_s21 = scalar_lea.hbm %s1025_s7, 512 }
  0x27   : > { %p804_p12 = scmp.ne.s32.totalorder %s1025_s7, %s803_s21  ;;  %p805_p13 = pneg %p1027_p11 }
  0x28   : > { %s808_s24 = scalar_lea.hbm %s1170_s0, 1024  ;;  %p809_p10 = scmp.lt.s32.totalorder %s1025_s7, %s1170_s0 }
  0x29   : > { %p806_p5 = pnand %p805_p13, %p804_p12  ;;  %p810_p1 = scmp.lt.s32.totalorder %s808_s24, %s803_s21 }
  0x2b   : > { %p807_p7 = pneg %p806_p5  ;;  %p811_p2 = por %p810_p1, %p809_p10 }
  0x2d   : > { %p812_p0 = pnand %p811_p2, %p807_p7 }
  0x2f   : > { %815 = shalt.err (!%p812_p0)
}
  0x30   : > { %s816_s27 = scalar_lea.vmem %s134_s14, 512  ;;  %s902_s30 = smov [#allocation3]  }
  0x31   : > { %p817_p3 = scmp.ne.s32.totalorder %s134_s14, %s816_s27  ;;  %s821_s3 = sshll.u32 %s902_s30, 4  ;;  %s822_s3 = int_to_ptr.vmem [resolvable:$false] %s821_s3 }
  0x32   : > { %s823_s4 = scalar_lea.vmem %s822_s3, 1024  ;;  %p824_p12 = scmp.lt.s32.totalorder %s134_s14, %s822_s3 }
  0x33   : > { %p819_p6 = pnand %p817_p3, %p805_p13  ;;  %p825_p5 = scmp.lt.s32.totalorder %s823_s4, %s816_s27 }
  0x35   : > { %p820_p9 = pneg %p819_p6  ;;  %p826_p4 = por %p825_p5, %p824_p12 }
  0x37   : > { %p827_p8 = pnand %p826_p4, %p820_p9 }
  0x39   : > { %830 = shalt.err (!%p827_p8)
}
  0x3a   : > { %725 = dma.hbm_to_vmem [thread:$0]  (!%p1027_p11), %s1025_s7, 512, %s134_s14, %s122_s19  }
  0x3b   : > { %p1185_p7 = scmp.ne.s32.totalorder %s1179_s17, 0 }
  0x3c   : > { %s1048_s5 = sand.u32 (!%p1185_p7), 1, %s891_s10   ;;  %p1186_p6 = scmp.ne.s32.totalorder (!%p1185_p7), %s1177_s15, 0 }
  0x3d   : > { %142 = sbr.rel (%p1185_p7) target bundleno = 461 (0x1cd), region = 28  ;;  %s669_s6 = sshll.u32 (!%p1185_p7), %s1048_s5, 5 }
  0x3e   : > { %s145_s8 = scalar_lea.sflag (!%p1185_p7), [#allocation4], %s1048_s5  ;;  %s148_s21 = scalar_lea.vmem (!%p1185_p7), [#allocation3], %s669_s6 }
  0x42   : > { %874 = dma.done.wait (%p1186_p6), %s145_s8, 512  }
  0x43   : > { %876 = vsyncadd (%p1186_p6), %s145_s8, 4294966784  ;;  %p1187_p4 = scmp.eq.s32.totalorder %s950_s13, 0 }
  0x45   : > { %878 = dma.done.wait (%p1187_p4), [#allocation7], 128   ;;  %p1188_p8 = pmov %p1187_p4 }
  0x46   : > { %v1060_v0 = vld [vmem:[%s148_s21 + $0x8] sm:$0xff]  ;;  %v1062_v1 = vld [vmem:[%s148_s21] sm:$0xff]  ;;  %v903_v2 = vmov 0.0   ;;  %s904_s17 = smov 90   ;;  %v1068_v3 = vld [vmem:[%s148_s21 + $0x10] sm:$0xff]  ;;  %s905_s15 = smov 91  }
  0x47   : > { %880 = vsyncadd (%p1188_p8), [#allocation7], 4294967168  ;;  %687 = vmatprep.subr.mxu1 %v903_v2  ;;  %483 = vmatprep.mubr.f32.mxu0 %v903_v2  ;;  %v364_v4 = vld [vmem:[%s148_s21 + $0x18] sm:$0xff]  ;;  %s906_s7 = smov 92   ;;  %s907_s14 = smov 108   ;;  %vm912_vm0 = vmmov 0  }
  0x48   : > { %371 = vrot.lane.b32.xlu0 %v1060_v0, %s904_s17  ;;  %369 = vrot.lane.b32.xlu1 %v1062_v1, %s904_s17  ;;  %s908_s18 = smov 109   ;;  %s909_s19 = smov 110   ;;  %vm377_vm1 = vcmask 736256   ;;  %vm351_vm2 = vcmask 744448   ;;  %vm325_vm3 = vcmask 752640   ;;  %vm299_vm4 = vcmask 883712  }
  0x49   : > { %s910_s22 = smov 126   ;;  %s911_s23 = smov 127   ;;  %705 = vmatprep.mubr.msk.f32.mxu1 %vm912_vm0, %v903_v2  ;;  %vm273_vm5 = vcmask 891904   ;;  %vm247_vm6 = vcmask 900096   ;;  %vm221_vm7 = vcmask 1031168   ;;  %vm195_vm8 = vcmask 1039360  }
  0x4a   : > { %v387_v57 = vld [vmem:[#allocation6] sm:$0xff]  ;;  %vm415_vm9 = vcmask 588800   ;;  %s708_s24 = smul.u32 24, %s1048_s5  ;;  %s567_s6 = scalar_lea.sflag [#allocation5], %s1048_s5 }
  0x4b   : > { %s709_s25 = smul.u32 384, %s950_s13  ;;  %p1189_p11 = scmp.ne.s32.totalorder %s1183_s29, 0 }
  0x4c   : > { %373 = vrot.lane.b32.xlu0 %v1068_v3, %s904_s17  ;;  %345 = vrot.lane.b32.xlu1 %v1060_v0, %s905_s15  ;;  %s172_s26 = scalar_lea.vmem [#allocation8], %s708_s24  ;;  %s913_s13 = smov [#allocation8]  }
  0x4d   : > { %s581_s27 = sshll.u32 %s172_s26, 4  ;;  %s1133_s4 = scalar_lea.hbm %s1172_s2, %s709_s25  ;;  %s582_s27 = int_to_ptr.vmem [resolvable:$true] %s581_s27 }
  0x4e   : > { %s831_s8 = scalar_lea.vmem %s582_s27, 384  ;;  %s835_s21 = sshll.u32 %s913_s13, 4  ;;  %s836_s21 = int_to_ptr.vmem [resolvable:$false] %s835_s21 }
  0x4f   : > { %p832_p9 = scmp.ne.s32.totalorder %s582_s27, %s831_s8  ;;  %p838_p1 = scmp.lt.s32.totalorder %s582_s27, %s836_s21 }
  0x50   : > { %347 = vrot.lane.b32.xlu0 %v1068_v3, %s905_s15  ;;  %343 = vrot.lane.b32.xlu1 %v1062_v1, %s905_s15 }
  0x51   : > { %p833_p13 = pnand %p832_p9, %p1189_p11 }
  0x53   : > { %p834_p10 = pneg %p833_p13 }
  0x54   : > { %375 = vrot.lane.b32.xlu0 %v364_v4, %s904_s17  ;;  %319 = vrot.lane.b32.xlu1 %v1060_v0, %s906_s7  ;;  %s837_s17 = scalar_lea.vmem %s836_s21, 768 }
  0x55   : > { %p839_p2 = scmp.lt.s32.totalorder %s837_s17, %s831_s8 }
  0x57   : > { %p840_p0 = por %p839_p2, %p838_p1 }
  0x58   : > { %321 = vrot.lane.b32.xlu0 %v1068_v3, %s906_s7  ;;  %317 = vrot.lane.b32.xlu1 %v1062_v1, %s906_s7 }
  0x59   : > { %p841_p3 = pnand %p840_p0, %p834_p10 }
  0x5c   : > { %349 = vrot.lane.b32.xlu0 %v364_v4, %s905_s15  ;;  %293 = vrot.lane.b32.xlu1 %v1060_v0, %s907_s14 }
  0x60   : > { %295 = vrot.lane.b32.xlu0 %v1068_v3, %s907_s14  ;;  %291 = vrot.lane.b32.xlu1 %v1062_v1, %s907_s14 }
  0x64   : > { %323 = vrot.lane.b32.xlu0 %v364_v4, %s906_s7  ;;  %267 = vrot.lane.b32.xlu1 %v1060_v0, %s908_s18 }
  0x68   : > { %269 = vrot.lane.b32.xlu0 %v1068_v3, %s908_s18  ;;  %265 = vrot.lane.b32.xlu1 %v1062_v1, %s908_s18 }
  0x6c   : > { %297 = vrot.lane.b32.xlu0 %v364_v4, %s907_s14  ;;  %241 = vrot.lane.b32.xlu1 %v1060_v0, %s909_s19 }
  0x70   : > { %243 = vrot.lane.b32.xlu0 %v1068_v3, %s909_s19  ;;  %239 = vrot.lane.b32.xlu1 %v1062_v1, %s909_s19 }
  0x74   : > { %271 = vrot.lane.b32.xlu0 %v364_v4, %s908_s18  ;;  %215 = vrot.lane.b32.xlu1 %v1060_v0, %s910_s22 }
  0x78   : > { %217 = vrot.lane.b32.xlu0 %v1068_v3, %s910_s22  ;;  %213 = vrot.lane.b32.xlu1 %v1062_v1, %s910_s22 }
  0x7c   : > { %245 = vrot.lane.b32.xlu0 %v364_v4, %s909_s19  ;;  %189 = vrot.lane.b32.xlu1 %v1060_v0, %s911_s23 }
  0x80   : > { %191 = vrot.lane.b32.xlu0 %v1068_v3, %s911_s23  ;;  %187 = vrot.lane.b32.xlu1 %v1062_v1, %s911_s23 }
  0x84   : > { %219 = vrot.lane.b32.xlu0 %v364_v4, %s910_s22  ;;  %193 = vrot.lane.b32.xlu1 %v364_v4, %s911_s23 }
  0xba   : > { %v372_v5 = vpop.permute.xlu0 %371  ;;  %v370_v6 = vpop.permute.xlu1 %369 }
  0xbb   : > { %v378_v10 = vsel %vm377_vm1, %v370_v6, %v372_v5 }
  0xbe   : > { %v374_v7 = vpop.permute.xlu0 %373  ;;  %v346_v8 = vpop.permute.xlu1 %345 }
  0xbf   : > { %v379_v9 = vsel %vm377_vm1, %v372_v5, %v374_v7 }
  0xc0   : > { %433 = vmatprep.subr.mxu0 %v379_v9 }
  0xc1   : > { %434 = vmatpush1.msra.mxu0 %v378_v10 }
  0xc2   : > { %v348_v11 = vpop.permute.xlu0 %347  ;;  %v344_v12 = vpop.permute.xlu1 %343 }
  0xc3   : > { %v353_v13 = vsel %vm351_vm2, %v346_v8, %v348_v11  ;;  %v352_v14 = vsel %vm351_vm2, %v344_v12, %v346_v8 }
  0xc4   : > { %435 = vmatprep.subr.mxu0 %v353_v13 }
  0xc5   : > { %436 = vmatpush1.msra.mxu0 %v352_v14 }
  0xc6   : > { %v376_v15 = vpop.permute.xlu0 %375  ;;  %v320_v16 = vpop.permute.xlu1 %319 }
  0xc7   : > { %v380_v17 = vsel %vm377_vm1, %v374_v7, %v376_v15 }
  0xc8   : > { %688 = vmatpush3.msra.mxu1 %v380_v17 }
  0xc9   : > { %689 = vmatprep.subr.mxu1 %v903_v2 }
  0xca   : > { %v322_v18 = vpop.permute.xlu0 %321  ;;  %v318_v19 = vpop.permute.xlu1 %317 }
  0xcb   : > { %v327_v20 = vsel %vm325_vm3, %v320_v16, %v322_v18  ;;  %v326_v21 = vsel %vm325_vm3, %v318_v19, %v320_v16 }
  0xcc   : > { %437 = vmatprep.subr.mxu0 %v327_v20 }
  0xcd   : > { %438 = vmatpush1.msra.mxu0 %v326_v21 }
  0xce   : > { %v350_v22 = vpop.permute.xlu0 %349  ;;  %v294_v23 = vpop.permute.xlu1 %293 }
  0xcf   : > { %v354_v24 = vsel %vm351_vm2, %v348_v11, %v350_v22 }
  0xd0   : > { %690 = vmatpush3.msra.mxu1 %v354_v24 }
  0xd1   : > { %691 = vmatprep.subr.mxu1 %v903_v2 }
  0xd2   : > { %v296_v25 = vpop.permute.xlu0 %295  ;;  %v292_v26 = vpop.permute.xlu1 %291 }
  0xd3   : > { %v301_v27 = vsel %vm299_vm4, %v294_v23, %v296_v25  ;;  %v300_v28 = vsel %vm299_vm4, %v292_v26, %v294_v23 }
  0xd4   : > { %439 = vmatprep.subr.mxu0 %v301_v27 }
  0xd5   : > { %440 = vmatpush1.msra.mxu0 %v300_v28 }
  0xd6   : > { %v324_v29 = vpop.permute.xlu0 %323  ;;  %v268_v30 = vpop.permute.xlu1 %267 }
  0xd7   : > { %v328_v31 = vsel %vm325_vm3, %v322_v18, %v324_v29 }
  0xd8   : > { %692 = vmatpush3.msra.mxu1 %v328_v31 }
  0xd9   : > { %693 = vmatprep.subr.mxu1 %v903_v2 }
  0xda   : > { %v270_v32 = vpop.permute.xlu0 %269  ;;  %v266_v33 = vpop.permute.xlu1 %265 }
  0xdb   : > { %v275_v34 = vsel %vm273_vm5, %v268_v30, %v270_v32  ;;  %v274_v35 = vsel %vm273_vm5, %v266_v33, %v268_v30 }
  0xdc   : > { %441 = vmatprep.subr.mxu0 %v275_v34 }
  0xdd   : > { %442 = vmatpush1.msra.mxu0 %v274_v35 }
  0xde   : > { %v298_v36 = vpop.permute.xlu0 %297  ;;  %v242_v37 = vpop.permute.xlu1 %241 }
  0xdf   : > { %v302_v38 = vsel %vm299_vm4, %v296_v25, %v298_v36 }
  0xe0   : > { %694 = vmatpush3.msra.mxu1 %v302_v38 }
  0xe1   : > { %695 = vmatprep.subr.mxu1 %v903_v2 }
  0xe2   : > { %v244_v39 = vpop.permute.xlu0 %243  ;;  %v240_v40 = vpop.permute.xlu1 %239 }
  0xe3   : > { %v249_v41 = vsel %vm247_vm6, %v242_v37, %v244_v39  ;;  %v248_v42 = vsel %vm247_vm6, %v240_v40, %v242_v37 }
  0xe4   : > { %443 = vmatprep.subr.mxu0 %v249_v41 }
  0xe5   : > { %444 = vmatpush1.msra.mxu0 %v248_v42 }
  0xe6   : > { %v272_v43 = vpop.permute.xlu0 %271  ;;  %v216_v44 = vpop.permute.xlu1 %215 }
  0xe7   : > { %v276_v45 = vsel %vm273_vm5, %v270_v32, %v272_v43 }
  0xe8   : > { %696 = vmatpush3.msra.mxu1 %v276_v45 }
  0xe9   : > { %697 = vmatprep.subr.mxu1 %v903_v2 }
  0xea   : > { %v218_v46 = vpop.permute.xlu0 %217  ;;  %v214_v47 = vpop.permute.xlu1 %213 }
  0xeb   : > { %v223_v48 = vsel %vm221_vm7, %v216_v44, %v218_v46  ;;  %v222_v49 = vsel %vm221_vm7, %v214_v47, %v216_v44 }
  0xec   : > { %445 = vmatprep.subr.mxu0 %v223_v48 }
  0xed   : > { %446 = vmatpush1.msra.mxu0 %v222_v49 }
  0xee   : > { %v246_v50 = vpop.permute.xlu0 %245  ;;  %v190_v51 = vpop.permute.xlu1 %189 }
  0xef   : > { %v250_v52 = vsel %vm247_vm6, %v244_v39, %v246_v50 }
  0xf0   : > { %698 = vmatpush3.msra.mxu1 %v250_v52 }
  0xf1   : > { %699 = vmatprep.subr.mxu1 %v903_v2 }
  0xf2   : > { %v192_v53 = vpop.permute.xlu0 %191  ;;  %v188_v54 = vpop.permute.xlu1 %187 }
  0xf3   : > { %v197_v55 = vsel %vm195_vm8, %v190_v51, %v192_v53  ;;  %v196_v56 = vsel %vm195_vm8, %v188_v54, %v190_v51 }
  0xf4   : > { %447 = vmatprep.subr.mxu0 %v197_v55 }
  0xf5   : > { %448 = vmatpush1.msra.mxu0 %v196_v56 }
  0xf6   : > { %v220_v58 = vpop.permute.xlu0 %219  ;;  %v194_v59 = vpop.permute.xlu1 %193  ;;  %449 = vmatprep.subr.mxu0 %v1060_v0 }
  0xf7   : > { %450 = vmatpush1.msra.mxu0 %v1062_v1  ;;  %v224_v60 = vsel %vm221_vm7, %v218_v46, %v220_v58  ;;  %v198_v61 = vsel %vm195_vm8, %v192_v53, %v194_v59 }
  0xf8   : > { %700 = vmatpush3.msra.mxu1 %v224_v60  ;;  %671 = vmatmul.mubr.msk.f32.vlgmr.msra.gmra.mxu0 %vm415_vm9, %v387_v57 }
  0xf9   : > { %701 = vmatprep.subr.mxu1 %v903_v2 }
  0xfa   : > { %702 = vmatpush3.msra.mxu1 %v198_v61 }
  0xfb   : > { %703 = vmatprep.subr.mxu1 %v903_v2 }
  0xfc   : > { %704 = vmatpush3.msra.mxu1 %v1068_v3 }
  0xfd   : > { %706 = vmatmul.mubr.msk.f32.vlgmr.msra.gmra.mxu1 %vm415_vm9, %v387_v57 }
 0x1b8   : > { %v485_v62 = vpop.f32.mrf.mxu0 }
 0x1b9   : > { %v560_v63 = vmax.f32 %v485_v62, 0.0 }
 0x1ba   : > { %v487_v0 = vpop.f32.mrf.mxu0 }
 0x1bb   : > { %563 = vst [vmem:[%s172_s26] sm:$0xff] %v560_v63  ;;  %v561_v1 = vmax.f32 %v487_v0, 0.0 }
 0x1bd   : > { %564 = vst [vmem:[%s172_s26 + $0x8] sm:$0xff] %v561_v1  ;;  %v556_v4 = vpop.f32.mrf.mxu1 }
 0x1be   : > { %v562_v5 = vmax.f32 %v556_v4, 0.0 }
 0x1bf   : > { %v707_v2 = vpop.f32.mrf.mxu1 }
 0x1c0   : > { %565 = vst [vmem:[%s172_s26 + $0x10] sm:$0xff] %v562_v5 }
 0x1c1   : > { %844 = shalt.err (!%p841_p3)
}
 0x1c2   : > { %s845_s15 = scalar_lea.hbm %s1133_s4, 384  ;;  %s849_s14 = scalar_lea.hbm %s1172_s2, 768 }
 0x1c3   : > { %p846_p12 = scmp.ne.s32.totalorder %s1133_s4, %s845_s15  ;;  %p850_p6 = scmp.lt.s32.totalorder %s1133_s4, %s1172_s2 }
 0x1c4   : > { %p851_p4 = scmp.lt.s32.totalorder %s849_s14, %s845_s15 }
 0x1c5   : > { %p847_p5 = pnand %p846_p12, %p1189_p11 }
 0x1c6   : > { %p852_p8 = por %p851_p4, %p850_p6 }
 0x1c7   : > { %p848_p7 = pneg %p847_p5 }
 0x1c9   : > { %p853_p9 = pnand %p852_p8, %p848_p7 }
 0x1cb   : > { %856 = shalt.err (!%p853_p9)
}
 0x1cc   : > { %716 = dma.vmem_to_hbm [thread:$0]  (%p1189_p11), %s582_s27, 384, %s1133_s4, %s567_s6  }
 0x1cd PF: > { %s593_s22 = sand.u32 1, %s887_s9   ;;  %p1190_p13 = scmp.ne.s32.totalorder %s1178_s16, 0 }
 0x1ce   : > { %p1191_p10 = scmp.ge.s32.totalorder %s899_s12, 2  ;;  %s594_s23 = scalar_lea.sflag [#allocation5], %s593_s22 }
 0x1d0   : > { %p727_p1 = pnand %p1191_p10, %p1190_p13 }
 0x1d2   : > { %p728_p2 = pneg %p727_p1 }
 0x1d4   : > { %882 = dma.done.wait (%p728_p2), %s594_s23, 384  }
 0x1d5   : > { %884 = vsyncadd (%p728_p2), %s594_s23, 4294966912  ;;  %p16_p0 = scmp.ge.s32.totalorder %s977_s20, 4   ;;  %s1192_s9 = smov %s891_s10 }
 0x1d6   : > { %s1193_s10 = smov %s895_s11  ;;  %s1194_s11 = smov %s1004_s28 }
 0x1d7   : > { %s1195_s12 = smov %s977_s20  ;;  %18 = sbr.rel (!%p16_p0) target bundleno = 6 (0x6), region = 77 }
 0x1dc   :  { %599 = vsyncpa [#allocation4], 1 }
 0x1dd   :  { %601 = vsyncpa [#allocation4 + $0x1], 1 }
 0x1de   :  { %602 = vsyncpa [#allocation7], 1 }
 0x1df   :  { %603 = vsyncpa [#allocation5], 1 }
 0x1e0   :  { %605 = vsyncpa [#allocation5 + $0x1], 1 }

</bundles_post_ra>
